<compile_context>
chip_gen: v6e
topology: v6e:2x2x1
jax: 0.10.0
libtpu: 0.0.40
codegen_flags: <defaults>
</compile_context>

<pallas_src>
import numpy as np
import jax
import jax.numpy as jnp
from jax.experimental import pallas as pl
from jax.experimental.pallas import tpu as pltpu  # noqa: F401  (TPU backend import)


def _up8(n):
    return (n + 7) // 8 * 8


# ----------------------------------------------------------------------------
# Wrapper: one-time weight re-layouts (tiny XLA work), single grid-less pallas_call
# ----------------------------------------------------------------------------
def adarcnn_forward(x, params):
    """Fused ADARCNN forward (eval mode). x: (B, Cin, L) float32."""
    c1w, c1b, c2w, c2b, f1w, f1b, f2w, f2b = params
    B, Cin, L = x.shape
    F1, _, K = c1w.shape
    F2 = c2w.shape[0]
    H = f1w.shape[0]
    OUT = f2w.shape[0]
    pad = (K - 1) // 2
    assert L % 4 == 0, "both MaxPool1d(2,2) stages require L % 4 == 0"
    Lh1, Lh2 = L // 2, L // 4
    D1, D2 = Lh1 * F1, Lh2 * F2          # pooled conv1 / conv2 flattened lane widths
    P = L + 2 * pad                       # 'same'-padded input length
    # TODO(synk): the PyTorch __init__ sizes fc1 at (seq_length//2)*(2*num_filters), which is
    # inconsistent with the forward's two pools; fc1 here is sized to the actual flattened
    # dimension (seq_length//4)*(2*num_filters) so the forward is well-defined.
    assert f1w.shape[1] == D2, "fc1 must be sized to the actual flattened dimension"

    NC = max(128, 2 * D1, 2 * D2, H, OUT)   # slab lane width (128 for the demo config)

    # ---- one-time weight re-layouts (outside the kernel) -----------------------------
    # conv1 as a banded matmul: column (half, t, f) holds c1w[f, ci, k] at row p*Cin+ci
    # iff padded input position p == 2t + half + k.  Lane halves = [even | odd] output
    # positions, so MaxPool1d(2,2) becomes max-of-halves inside the kernel.
    p_i = np.arange(P)[:, None, None, None]
    k_i = np.arange(K)[None, :, None, None]
    h_i = np.arange(2)[None, None, :, None]
    t_i = np.arange(Lh1)[None, None, None, :]
    S1 = (p_i == 2 * t_i + h_i + k_i).astype(np.float32)            # (P, K, 2, Lh1)
    W1 = jnp.einsum("pkht,fck->pchtf", jnp.asarray(S1), c1w).reshape(P * Cin, 2 * D1)

    # conv2 likewise, reading the pooled conv1 lane layout (row = t*F1 + f); the band
    # truncating at t in [0, Lh1) implements the 'same' zero padding for free.
    u_i = np.arange(Lh1)[:, None, None, None]
    j_i = np.arange(Lh2)[None, None, None, :]
    S2 = (u_i == 2 * j_i + h_i + k_i - pad).astype(np.float32)      # (Lh1, K, 2, Lh2)
    W2 = jnp.einsum("ukhj,gfk->ufhjg", jnp.asarray(S2), c2w).reshape(Lh1 * F1, 2 * D2)

    # fc1 with the PyTorch NCL flatten index (g*Lh2 + j) folded into the row order
    # j*F2 + g of the pooled conv2 lane layout; fc2 is just transposed.
    Wf1 = jnp.transpose(f1w.reshape(H, F2, Lh2), (2, 1, 0)).reshape(D2, H)
    Wf2 = jnp.transpose(f2w)                                        # (H, OUT)

    # biases, pre-tiled to the position-blocked lane layouts, in one 8-row block
    bias_blk = jnp.zeros((8, NC), jnp.float32)
    bias_blk = bias_blk.at[0, :D1].set(jnp.tile(c1b, Lh1))
    bias_blk = bias_blk.at[1, :D2].set(jnp.tile(c2b, Lh2))
    bias_blk = bias_blk.at[2, :H].set(f1b)
    bias_blk = bias_blk.at[3, :OUT].set(f2b)

    # pack everything into ONE slab; every block starts at an 8-aligned row offset
    blocks, offs, padded, row = [W1, W2, Wf1, Wf2, bias_blk], [], [], 0
    for blk in blocks:
        offs.append(row)
        rp = _up8(blk.shape[0])
        padded.append(jnp.pad(blk, ((0, rp - blk.shape[0]), (0, NC - blk.shape[1]))))
        row += rp
    w_slab = jnp.concatenate(padded, axis=0)                        # (rows, NC) f32
    r1, r2, rf1, rf2, rb = offs

    # conv1 im2col input flattened to one lane axis: lane index = p*Cin + ci
    x_flat = jnp.pad(jnp.transpose(x, (0, 2, 1)),
                     ((0, 0), (pad, pad), (0, 0))).reshape(B, P * Cin)

    # ---- fused kernel: 4 matmuls + 3 elementwise stages, everything vreg-resident ----
    def kernel(x_ref, w_ref, o_ref):
        bias = w_ref[rb:rb + 8, :]                                  # one aligned (8, NC) load
        xv = x_ref[...]                                             # (B, P*Cin)

        # conv1 (+ shared bias, ReLU) + MaxPool1d(2,2).  Pool = max of lane halves;
        # bias/ReLU after the max is identical to the reference (shared bias commutes
        # with max, ReLU is monotone).
        z1 = jnp.dot(xv, w_ref[r1:r1 + P * Cin, :2 * D1],
                     preferred_element_type=jnp.float32)            # (B, 2*D1)
        h1 = jnp.maximum(jnp.maximum(z1[:, :D1], z1[:, D1:]) + bias[0:1, :D1], 0.0)

        # conv2 (+ bias, ReLU) + MaxPool1d(2,2): same even/odd-halves trick
        z2 = jnp.dot(h1, w_ref[r2:r2 + D1, :2 * D2],
                     preferred_element_type=jnp.float32)            # (B, 2*D2)
        h2 = jnp.maximum(jnp.maximum(z2[:, :D2], z2[:, D2:]) + bias[1:2, :D2], 0.0)

        # NCL flatten already folded into Wf1's row order -> fc1 (+ ReLU) is one matmul
        h3 = jnp.maximum(jnp.dot(h2, w_ref[rf1:rf1 + D2, :H],
                                 preferred_element_type=jnp.float32) + bias[2:3, :H], 0.0)

        # TODO(synk): Dropout(p=0.3) uses train-mode RNG; this is the eval/inference
        # forward where nn.Dropout is an identity, so it is intentionally a no-op.
        o_ref[...] = (jnp.dot(h3, w_ref[rf2:rf2 + H, :OUT],
                              preferred_element_type=jnp.float32)
                      + bias[3:4, :OUT]).astype(o_ref.dtype)

    return pl.pallas_call(
        kernel,
        out_shape=jax.ShapeDtypeStruct((B, OUT), jnp.float32),
    )(x_flat, w_slab)


# ----------------------------------------------------------------------------
# Pure-JAX reference (mirrors PyTorch semantics) for validation.
# ----------------------------------------------------------------------------
def reference_forward(x, params):
    (c1w, c1b, c2w, c2b, f1w, f1b, f2w, f2b) = params

    def conv1d(x, w, b):
        y = jax.lax.conv_general_dilated(
            x, w, window_strides=(1,), padding=[(2, 2)],
            dimension_numbers=("NCH", "OIH", "NCH"))
        return y + b[None, :, None]

    def pool(x):
        B, C, L = x.shape
        return jnp.max(x[:, :, : 2 * (L // 2)].reshape(B, C, L // 2, 2), axis=-1)

    h = jax.nn.relu(conv1d(x, c1w, c1b))
    h = pool(h)
    h = jax.nn.relu(conv1d(h, c2w, c2b))
    h = pool(h)
    h = h.reshape(x.shape[0], -1)
    h = jax.nn.relu(h @ f1w.T + f1b)
    return h @ f2w.T + f2b


if __name__ == "__main__":
    # Small shapes consistent with the module (seq divisible by 4 so both pools are exact).
    B, Cin, L = 2, 4, 16
    K = 5
    F1 = 8            # num_filters
    F2 = 2 * F1       # num_filters * 2
    H = 32            # hidden_dim
    Dflat = (L // 4) * F2   # actual flattened dim after two pools (see TODO in wrapper)

    key = jax.random.PRNGKey(0)
    ks = jax.random.split(key, 9)
    params = (
        0.1 * jax.random.normal(ks[0], (F1, Cin, K), jnp.float32),   # conv1.weight
        0.1 * jax.random.normal(ks[1], (F1,), jnp.float32),          # conv1.bias
        0.1 * jax.random.normal(ks[2], (F2, F1, K), jnp.float32),    # conv2.weight
        0.1 * jax.random.normal(ks[3], (F2,), jnp.float32),          # conv2.bias
        0.1 * jax.random.normal(ks[4], (H, Dflat), jnp.float32),     # fc1.weight
        0.1 * jax.random.normal(ks[5], (H,), jnp.float32),           # fc1.bias
        0.1 * jax.random.normal(ks[6], (2, H), jnp.float32),         # fc2.weight
        0.1 * jax.random.normal(ks[7], (2,), jnp.float32),           # fc2.bias
    )
    x = jax.random.normal(ks[8], (B, Cin, L), jnp.float32)

    fwd = jax.jit(adarcnn_forward)
    out = jax.block_until_ready(fwd(x, params))

    ref = jax.block_until_ready(reference_forward(x, params))
    np.testing.assert_allclose(np.asarray(out), np.asarray(ref), rtol=1e-3, atol=1e-3)

    print("KERNEL_OK")
</pallas_src>

<mosaic_0001>
module attributes {stable_mosaic.version = 11 : i64} {
  func.func @kernel(%arg0: memref<2x80xf32, #tpu.memory_space<vmem>>, %arg1: memref<248x128xf32, #tpu.memory_space<vmem>>, %arg2: memref<2x2xf32, #tpu.memory_space<vmem>>) attributes {dimension_semantics = [], scalar_prefetch = 0 : i64, scratch_operands = 0 : i64, tpu.core_type = #tpu.core_type<tc>} {
    %c240 = arith.constant 240 : index
    %c0 = arith.constant 0 : index
    %0 = vector.load %arg1[%c240, %c0] : memref<248x128xf32, #tpu.memory_space<vmem>>, vector<8x128xf32>
    %c0_0 = arith.constant 0 : index
    %c0_1 = arith.constant 0 : index
    %1 = vector.load %arg0[%c0_0, %c0_1] : memref<2x80xf32, #tpu.memory_space<vmem>>, vector<2x80xf32>
    %c0_2 = arith.constant 0 : index
    %c0_3 = arith.constant 0 : index
    %2 = vector.load %arg1[%c0_2, %c0_3] : memref<248x128xf32, #tpu.memory_space<vmem>>, vector<80x128xf32>
    %cst = arith.constant dense<0.000000e+00> : vector<2x128xf32>
    %3 = tpu.matmul %1, %2, %cst {dimension_numbers = #tpu.dot_dimension_numbers<[1], [0], [0], [1], [0, 0, 1, 1], [], []>} : vector<2x80xf32>, vector<80x128xf32>, vector<2x128xf32> -> vector<2x128xf32>
    %4 = vector.extract_strided_slice %3 {offsets = [0, 0], sizes = [2, 64], strides = [1, 1]} : vector<2x128xf32> to vector<2x64xf32>
    %5 = vector.extract_strided_slice %3 {offsets = [0, 64], sizes = [2, 64], strides = [1, 1]} : vector<2x128xf32> to vector<2x64xf32>
    %6 = arith.maximumf %4, %5 : vector<2x64xf32>
    %7 = vector.extract_strided_slice %0 {offsets = [0, 0], sizes = [1, 64], strides = [1, 1]} : vector<8x128xf32> to vector<1x64xf32>
    %8 = vector.broadcast %7 : vector<1x64xf32> to vector<2x64xf32>
    %9 = arith.addf %6, %8 : vector<2x64xf32>
    %cst_4 = arith.constant 0.000000e+00 : f32
    %10 = vector.broadcast %cst_4 : f32 to vector<2x64xf32>
    %11 = arith.maximumf %9, %10 : vector<2x64xf32>
    %c80 = arith.constant 80 : index
    %c0_5 = arith.constant 0 : index
    %12 = vector.load %arg1[%c80, %c0_5] : memref<248x128xf32, #tpu.memory_space<vmem>>, vector<64x128xf32>
    %cst_6 = arith.constant dense<0.000000e+00> : vector<2x128xf32>
    %13 = tpu.matmul %11, %12, %cst_6 {dimension_numbers = #tpu.dot_dimension_numbers<[1], [0], [0], [1], [0, 0, 1, 1], [], []>} : vector<2x64xf32>, vector<64x128xf32>, vector<2x128xf32> -> vector<2x128xf32>
    %14 = vector.extract_strided_slice %13 {offsets = [0, 0], sizes = [2, 64], strides = [1, 1]} : vector<2x128xf32> to vector<2x64xf32>
    %15 = vector.extract_strided_slice %13 {offsets = [0, 64], sizes = [2, 64], strides = [1, 1]} : vector<2x128xf32> to vector<2x64xf32>
    %16 = arith.maximumf %14, %15 : vector<2x64xf32>
    %17 = vector.extract_strided_slice %0 {offsets = [1, 0], sizes = [1, 64], strides = [1, 1]} : vector<8x128xf32> to vector<1x64xf32>
    %18 = vector.broadcast %17 : vector<1x64xf32> to vector<2x64xf32>
    %19 = arith.addf %16, %18 : vector<2x64xf32>
    %cst_7 = arith.constant 0.000000e+00 : f32
    %20 = vector.broadcast %cst_7 : f32 to vector<2x64xf32>
    %21 = arith.maximumf %19, %20 : vector<2x64xf32>
    %c144 = arith.constant 144 : index
    %c0_8 = arith.constant 0 : index
    %22 = vector.load %arg1[%c144, %c0_8] : memref<248x128xf32, #tpu.memory_space<vmem>>, vector<64x32xf32>
    %cst_9 = arith.constant dense<0.000000e+00> : vector<2x32xf32>
    %23 = tpu.matmul %21, %22, %cst_9 {dimension_numbers = #tpu.dot_dimension_numbers<[1], [0], [0], [1], [0, 0, 1, 1], [], []>} : vector<2x64xf32>, vector<64x32xf32>, vector<2x32xf32> -> vector<2x32xf32>
    %24 = vector.extract_strided_slice %0 {offsets = [2, 0], sizes = [1, 32], strides = [1, 1]} : vector<8x128xf32> to vector<1x32xf32>
    %25 = vector.broadcast %24 : vector<1x32xf32> to vector<2x32xf32>
    %26 = arith.addf %23, %25 : vector<2x32xf32>
    %cst_10 = arith.constant 0.000000e+00 : f32
    %27 = vector.broadcast %cst_10 : f32 to vector<2x32xf32>
    %28 = arith.maximumf %26, %27 : vector<2x32xf32>
    %c208 = arith.constant 208 : index
    %c0_11 = arith.constant 0 : index
    %29 = vector.load %arg1[%c208, %c0_11] : memref<248x128xf32, #tpu.memory_space<vmem>>, vector<32x2xf32>
    %cst_12 = arith.constant dense<0.000000e+00> : vector<2x2xf32>
    %30 = tpu.matmul %28, %29, %cst_12 {dimension_numbers = #tpu.dot_dimension_numbers<[1], [0], [0], [1], [0, 0, 1, 1], [], []>} : vector<2x32xf32>, vector<32x2xf32>, vector<2x2xf32> -> vector<2x2xf32>
    %31 = vector.extract_strided_slice %0 {offsets = [3, 0], sizes = [1, 2], strides = [1, 1]} : vector<8x128xf32> to vector<1x2xf32>
    %32 = vector.broadcast %31 : vector<1x2xf32> to vector<2x2xf32>
    %33 = arith.addf %30, %32 : vector<2x2xf32>
    %c0_13 = arith.constant 0 : index
    %c0_14 = arith.constant 0 : index
    %34 = vector.load %arg2[%c0_13, %c0_14] : memref<2x2xf32, #tpu.memory_space<vmem>>, vector<2x2xf32>
    tpu.vector_store %arg2[%c0_13, %c0_14], %33 {strides = array<i32>} : memref<2x2xf32, #tpu.memory_space<vmem>>, vector<2x2xf32>,
    return
  }
}

</mosaic_0001>

<bundles_post_ra>
// kernel: tile.13
= control target key start
LH: loop header
LB: loop body
LE: loop exit
PB: predicated region body
PF: predicated region fallthrough
CT: control target
= control target key end

     0   :  { %s22_s0 = inlined_call_operand.vmem [shape: f32[8], index: 0, kind: input, shape index: {}]   ;;  %s23_s1 = inlined_call_operand.vmem [shape: f32[8,8], index: 1, kind: output, shape index: {}]  }
   0x1   :  { %v4_v0 = vld [vmem:[%s22_s0] ss:$0 sm:$0xff] }
   0x2   :  { %5 = vst [vmem:[%s23_s1] sm:$0xff] %v4_v0 }

// kernel: tile.18
= control target key start
LH: loop header
LB: loop body
LE: loop exit
PB: predicated region body
PF: predicated region fallthrough
CT: control target
= control target key end

     0   :  { %s22_s0 = inlined_call_operand.vmem [shape: f32[16], index: 0, kind: input, shape index: {}]   ;;  %s23_s1 = inlined_call_operand.vmem [shape: f32[4,16], index: 1, kind: output, shape index: {}]  }
   0x1   :  { %v4_v0 = vld [vmem:[%s22_s0] ss:$0 sm:$0xff] }
   0x2   :  { %5 = vst [vmem:[%s23_s1] sm:$0xf] %v4_v0 }

// kernel: adarcnn_forward.1
= control target key start
LH: loop header
LB: loop body
LE: loop exit
PB: predicated region body
PF: predicated region fallthrough
CT: control target
= control target key end

     0   :  { %v522_v1 = vmov 0.0   ;;  %vm523_vm0 = vmmov 0   ;;  %s688_s0 = inlined_call_operand.vmem [shape: f32[2,80], index: 0, kind: input, shape index: {}]   ;;  %s689_s1 = inlined_call_operand.vmem [shape: f32[248,128], index: 1, kind: input, shape index: {}]   ;;  %s690_s2 = inlined_call_operand.hbm [shape: f32[2,2], index: 2, kind: output, shape index: {}]  }
   0x1   :  { %v23_v0 = vld [vmem:[%s689_s1 + $0x48] sm:$0xff]  ;;  %424 = vmatprep.subr.mxu0 %v522_v1  ;;  %v22_v2 = vld [vmem:[%s689_s1 + $0x40] sm:$0xff]  ;;  %444 = vmatprep.mubr.msk.f32.mxu0 %vm523_vm0, %v522_v1  ;;  %v21_v3 = vld [vmem:[%s689_s1 + $0x38] sm:$0xff] }
   0x2   :  { %425 = vmatpush3.msra.mxu0 %v23_v0  ;;  %447 = vmatprep.subr.mxu1 %v522_v1 }
   0x3   :  { %426 = vmatprep.subr.mxu0 %v522_v1  ;;  %463 = vmatprep.mubr.msk.f32.mxu1 %vm523_vm0, %v522_v1 }
   0x4   :  { %7 = vsyncpa [#allocation3], 0  ;;  %427 = vmatpush3.msra.mxu0 %v22_v2  ;;  %v20_v4 = vld [vmem:[%s689_s1 + $0x30] sm:$0xff]  ;;  %v19_v5 = vld [vmem:[%s689_s1 + $0x28] sm:$0xff]  ;;  %vm24_vm1 = vcmask 654336   ;;  %s524_s18 = smov 64   ;;  %v103_v22 = vlaneseq }
   0x5   :  { %428 = vmatprep.subr.mxu0 %v522_v1  ;;  %v18_v6 = vld [vmem:[%s689_s1 + $0x20] sm:$0xff]  ;;  %v17_v7 = vld [vmem:[%s689_s1 + $0x18] sm:$0xff]  ;;  %v16_v8 = vld [vmem:[%s689_s1 + $0x10] sm:$0xff]  ;;  %vm117_vm2 = vcmask 523264   ;;  %vm296_vm3 = vcmask 261120   ;;  %s525_s16 = smov [#allocation2]  }
   0x6   :  { %429 = vmatpush3.msra.mxu0 %v21_v3  ;;  %v15_v9 = vld [vmem:[%s689_s1 + $0x8] sm:$0xff]  ;;  %v14_v10 = vld [vmem:[%s689_s1] sm:$0xff]  ;;  %v114_v14 = vld [vmem:[%s689_s1 + $0x78] sm:$0xff]  ;;  %v625_v23 = vshrl.u32 %v103_v22, 7  ;;  %s378_s17 = sshll.u32 %s525_s16, 4  ;;  %vm370_vm4 = vcmask 9216   ;;  %s379_s17 = int_to_ptr.vmem [resolvable:$true] %s378_s17 }
   0x7   :  { %430 = vmatprep.subr.mxu0 %v522_v1  ;;  %v13_v11 = vld [vmem:[%s688_s0] sm:$0x3]  ;;  %v116_v12 = vld [vmem:[%s689_s1 + $0x88] sm:$0xff]  ;;  %v113_v15 = vld [vmem:[%s689_s1 + $0x70] sm:$0xff]  ;;  %p505_p1 = scmp.lt.s32.totalorder %s379_s17, %s379_s17 }
   0x8   :  { %431 = vmatpush3.msra.mxu0 %v20_v4  ;;  %v115_v13 = vld [vmem:[%s689_s1 + $0x80] sm:$0xff]  ;;  %448 = vmatpush3.msra.mxu1 %v116_v12  ;;  %v112_v16 = vld [vmem:[%s689_s1 + $0x68] sm:$0xff]  ;;  %v110_v18 = vld [vmem:[%s689_s1 + $0x58] sm:$0xff]  ;;  %v105_v24 = vsub.s32 0, %v625_v23  ;;  %v198_v42 = vsub.s32 1, %v625_v23  ;;  %v212_v51 = vsub.s32 2, %v625_v23 }
   0x9   :  { %432 = vmatprep.subr.mxu0 %v522_v1  ;;  %449 = vmatprep.subr.mxu1 %v522_v1  ;;  %v111_v17 = vld [vmem:[%s689_s1 + $0x60] sm:$0xff]  ;;  %v109_v19 = vld [vmem:[%s689_s1 + $0x50] sm:$0xff]  ;;  %v209_v31 = vld [vmem:[%s689_s1 + $0xc8] sm:$0xff]  ;;  %v294_v57 = vsub.s32 3, %v625_v23 }
   0xa   :  { %433 = vmatpush3.msra.mxu0 %v19_v5  ;;  %450 = vmatpush3.msra.mxu1 %v115_v13  ;;  %v12_v25 = vld [vmem:[%s689_s1 + $0xf0] sm:$0xff]  ;;  %v208_v32 = vld [vmem:[%s689_s1 + $0xc0] sm:$0xff]  ;;  %v207_v33 = vld [vmem:[%s689_s1 + $0xb8] sm:$0xff] }
   0xb   :  { %434 = vmatprep.subr.mxu0 %v522_v1  ;;  %451 = vmatprep.subr.mxu1 %v522_v1  ;;  %v106_v26 = vrot.slane %v12_v25, %v105_v24  ;;  %v206_v34 = vld [vmem:[%s689_s1 + $0xb0] sm:$0xff]  ;;  %v205_v35 = vld [vmem:[%s689_s1 + $0xa8] sm:$0xff]  ;;  %v204_v36 = vld [vmem:[%s689_s1 + $0xa0] sm:$0xff]  ;;  %v199_v43 = vrot.slane %v12_v25, %v198_v42  ;;  %v213_v52 = vrot.slane %v12_v25, %v212_v51 }
   0xc   :  { %435 = vmatpush3.msra.mxu0 %v18_v6  ;;  %452 = vmatpush3.msra.mxu1 %v114_v14  ;;  %v203_v37 = vld [vmem:[%s689_s1 + $0x98] sm:$0xff]  ;;  %v202_v38 = vld [vmem:[%s689_s1 + $0x90] sm:$0xff]  ;;  %v291_v39 = vld [vmem:[%s689_s1 + $0xe8] sm:$0xff]  ;;  %v295_v58 = vrot.slane %v12_v25, %v294_v57 }
   0xd   :  { %436 = vmatprep.subr.mxu0 %v522_v1  ;;  %453 = vmatprep.subr.mxu1 %v522_v1  ;;  %v290_v48 = vld [vmem:[%s689_s1 + $0xe0] sm:$0xff]  ;;  %v289_v49 = vld [vmem:[%s689_s1 + $0xd8] sm:$0xff]  ;;  %v288_v50 = vld [vmem:[%s689_s1 + $0xd0] sm:$0xff]  ;;  %s500_s1 = scalar_lea.vmem %s379_s17, 32 }
   0xe   :  { %437 = vmatpush3.msra.mxu0 %v17_v7  ;;  %454 = vmatpush3.msra.mxu1 %v113_v15  ;;  %p501_p0 = scmp.ne.s32.totalorder %s379_s17, %s500_s1  ;;  %p506_p2 = scmp.lt.s32.totalorder %s500_s1, %s500_s1 }
   0xf   :  { %438 = vmatprep.subr.mxu0 %v522_v1  ;;  %455 = vmatprep.subr.mxu1 %v522_v1 }
  0x10   :  { %439 = vmatpush3.msra.mxu0 %v16_v8  ;;  %456 = vmatpush3.msra.mxu1 %v112_v16  ;;  %p507_p3 = por %p506_p2, %p505_p1 }
  0x11   :  { %440 = vmatprep.subr.mxu0 %v522_v1  ;;  %457 = vmatprep.subr.mxu1 %v522_v1 }
  0x12   :  { %441 = vmatpush3.msra.mxu0 %v15_v9  ;;  %458 = vmatpush3.msra.mxu1 %v111_v17  ;;  %p508_p4 = pnand %p507_p3, %p501_p0 }
  0x13   :  { %442 = vmatprep.subr.mxu0 %v522_v1  ;;  %459 = vmatprep.subr.mxu1 %v522_v1 }
  0x14   :  { %443 = vmatpush3.msra.mxu0 %v14_v10  ;;  %460 = vmatpush3.msra.mxu1 %v110_v18 }
  0x15   :  { %445 = vmatmul.mubr.msk.f32.vlgmr.msra.gmra.mxu0 %vm24_vm1, %v13_v11  ;;  %485 = vmatprep.subr.mxu0 %v522_v1 }
  0x16   :  { %493 = vmatprep.mubr.msk.f32.mxu0 %vm523_vm0, %v522_v1  ;;  %461 = vmatprep.subr.mxu1 %v522_v1 }
  0x17   :  { %462 = vmatpush3.msra.mxu1 %v109_v19  ;;  %486 = vmatpush3.msra.mxu0 %v291_v39 }
  0x18   :  { %466 = vmatprep.subr.mxu1 %v522_v1  ;;  %487 = vmatprep.subr.mxu0 %v522_v1 }
  0x19   :  { %488 = vmatpush3.msra.mxu0 %v290_v48 }
  0x1a   :  { %489 = vmatprep.subr.mxu0 %v522_v1 }
  0x1b   :  { %490 = vmatpush3.msra.mxu0 %v289_v49 }
  0x1c   :  { %491 = vmatprep.subr.mxu0 %v522_v1 }
  0x1d   :  { %492 = vmatpush3.msra.mxu0 %v288_v50 }
  0xd5   :  { %v94_v20 = vpop.f32.mrf.mxu0 }
  0xd6   :  { %99 = vrot.lane.b32.xlu0 %v94_v20, %s524_s18 }
  0xd7   :  { %v446_v21 = vpop.f32.mrf.mxu0 }
 0x148   :  { %v100_v27 = vpop.permute.xlu0 %99 }
 0x149   :  { %v102_v28 = vmax.f32 %v94_v20, %v100_v27 }
 0x14b   :  { %v107_v29 = vadd.f32 %v106_v26, %v102_v28 }
 0x14d   :  { %v108_v30 = vmax.f32 %v107_v29, 0.0 }
 0x14f   :  { %464 = vmatmul.mubr.msk.f32.vlgmr.msra.gmra.mxu1 %vm117_vm2, %v108_v30 }
 0x150   :  { %482 = vmatprep.mubr.msk.f32.mxu1 %vm523_vm0, %v522_v1  ;;  %467 = vmatpush3.msra.mxu1 %v209_v31 }
 0x151   :  { %468 = vmatprep.subr.mxu1 %v522_v1 }
 0x152   :  { %469 = vmatpush3.msra.mxu1 %v208_v32 }
 0x153   :  { %470 = vmatprep.subr.mxu1 %v522_v1 }
 0x154   :  { %471 = vmatpush3.msra.mxu1 %v207_v33 }
 0x155   :  { %472 = vmatprep.subr.mxu1 %v522_v1 }
 0x156   :  { %473 = vmatpush3.msra.mxu1 %v206_v34 }
 0x157   :  { %474 = vmatprep.subr.mxu1 %v522_v1 }
 0x158   :  { %475 = vmatpush3.msra.mxu1 %v205_v35 }
 0x159   :  { %476 = vmatprep.subr.mxu1 %v522_v1 }
 0x15a   :  { %477 = vmatpush3.msra.mxu1 %v204_v36 }
 0x15b   :  { %478 = vmatprep.subr.mxu1 %v522_v1 }
 0x15c   :  { %479 = vmatpush3.msra.mxu1 %v203_v37 }
 0x15d   :  { %480 = vmatprep.subr.mxu1 %v522_v1 }
 0x15e   :  { %481 = vmatpush3.msra.mxu1 %v202_v38 }
 0x20f   :  { %v187_v40 = vpop.f32.mrf.mxu1 }
 0x210   :  { %192 = vrot.lane.b32.xlu0 %v187_v40, %s524_s18 }
 0x211   :  { %v465_v41 = vpop.f32.mrf.mxu1 }
 0x282   :  { %v193_v44 = vpop.permute.xlu0 %192 }
 0x283   :  { %v195_v45 = vmax.f32 %v187_v40, %v193_v44 }
 0x285   :  { %v200_v46 = vadd.f32 %v199_v43, %v195_v45 }
 0x287   :  { %v201_v47 = vmax.f32 %v200_v46, 0.0 }
 0x289   :  { %483 = vmatmul.mubr.msk.f32.vlgmr.msra.gmra.mxu1 %vm117_vm2, %v201_v47 }
 0x349   :  { %v283_v53 = vpop.f32.mrf.mxu1 }
 0x34a   :  { %v284_v54 = vadd.f32 %v283_v53, %v213_v52 }
 0x34b   :  { %v484_v55 = vpop.f32.mrf.mxu1 }
 0x34c   :  { %v287_v56 = vmax.f32 %v284_v54, 0.0 }
 0x34e   :  { %494 = vmatmul.mubr.msk.f32.vlgmr.msra.gmra.mxu0 %vm296_vm3, %v287_v56 }
 0x40e   :  { %v366_v59 = vpop.f32.mrf.mxu0 }
 0x40f   :  { %v367_v60 = vadd.f32 %v366_v59, %v295_v58 }
 0x410   :  { %v495_v61 = vpop.f32.mrf.mxu0 }
 0x411   :  { %371 = vst.msk [vmem:[#allocation2] sm:$0x3] %vm370_vm4, %v367_v60 }
 0x412   :  { %511 = shalt.err (!%p508_p4)
}
 0x413   :  { %381 = dma.vmem_to_hbm [thread:$0]  %s379_s17, 32, %s690_s2, [#allocation3]  }
 0x414   :  { %520 = dma.done.wait [#allocation3], 32  }
 0x415   :  { %521 = vsyncadd [#allocation3], 4294967264 }
 0x416   :  { %385 = vsyncpa [#allocation3], 1 }

</bundles_post_ra>
